<compile_context>
chip_gen: v7x
topology: tpu7x:2x2x1
jax: 0.10.0
libtpu: 0.0.40
codegen_flags: <defaults>
</compile_context>

<pallas_src>
import functools

import jax
import jax.numpy as jnp
from jax.experimental import pallas as pl
from jax.experimental.pallas import tpu as pltpu


def _round_up(x, m):
    return (x + m - 1) // m * m


def _chip_defaults():
    """Per-generation (n_cores, tile_bytes_per_input, vmem_limit_bytes, use_core_parallel)."""
    kind = ""
    try:
        kind = jax.devices()[0].device_kind.lower()
    except Exception:
        pass
    if "v7" in kind:
        # 3.2 TB/s HBM, 64 MiB VMEM/TC, 2 TCs: big tiles + explicit core split.
        # 2 inputs x 2 bufs x 6 MiB = 24 MiB of input VMEM < 48 MiB limit.
        return 2, 6 * 1024 * 1024, 48 * 1024 * 1024, True
    if "v6" in kind:
        # Single TC, 128 MiB VMEM: 4 MiB tiles halve per-step overhead.
        return 1, 4 * 1024 * 1024, 64 * 1024 * 1024, False
    # v5e / unknown: HBM-bound already at 2 MiB tiles; single TensorCore.
    return 1, 2 * 1024 * 1024, 40 * 1024 * 1024, False


def _masked_mse_kernel(pred_ref, gt_ref, sum_ref, cnt_ref, *,
                       rows, tile_rows, blocks_per_core, num_blocks):
    c = pl.program_id(0)   # core-split axis
    i = pl.program_id(1)   # reduction axis ("arbitrary")

    @pl.when(i == 0)
    def _():
        sum_ref[...] = jnp.zeros_like(sum_ref)
        cnt_ref[...] = jnp.zeros_like(cnt_ref)

    blk = c * blocks_per_core + i          # unclamped global block index

    gt = gt_ref[...].astype(jnp.float32)
    pred = pred_ref[...].astype(jnp.float32)
    cols = gt.shape[1]
    k = tile_rows // 8

    range_mask = jnp.logical_and(gt > 0.0, gt < 95.0)
    diff = pred - gt

    def _accumulate(valid):
        # where() BEFORE accumulation so NaN/Inf in padded tail rows can never
        # leak into the sums.
        sq = jnp.where(valid, diff * diff, 0.0)
        cnt = valid.astype(jnp.int32)
        # Groups whole (8,128) sublane tiles -> layout-preserving vreg adds
        # into the resident (8, cols) output-block accumulators.
        sum_ref[...] += sq.reshape(k, 8, cols).sum(axis=0)
        cnt_ref[...] += cnt.reshape(k, 8, cols).sum(axis=0)

    is_tail = blk >= num_blocks - 1

    # Fast path: interior blocks contain only real rows -> no iota/bounds
    # check (VPU work per element drops ~25-30%).
    @pl.when(jnp.logical_not(is_tail))
    def _():
        _accumulate(range_mask)

    # Slow path: the ragged last block and any clamped padding blocks
    # (blk >= num_blocks) are neutralized by the row-bound check.
    @pl.when(is_tail)
    def _():
        row_ids = jax.lax.broadcasted_iota(jnp.int32, gt.shape, 0) + blk * tile_rows
        in_bounds = row_ids < rows
        _accumulate(jnp.logical_and(in_bounds, range_mask))


def masked_mse_loss(depth_pred, depth_gt, *, target_tile_bytes=None):
    """depth_pred: (B, 1, H, W); depth_gt: (B, H, W). Returns scalar f32."""
    pred = jnp.squeeze(depth_pred, axis=1)          # (B, H, W)
    B, H, W = pred.shape
    assert depth_gt.shape == (B, H, W)

    n_cores, tile_bytes, vmem_limit, use_core_parallel = _chip_defaults()
    if target_tile_bytes is not None:
        tile_bytes = target_tile_bytes

    pred_flat = pred.reshape(-1)
    gt_flat = depth_gt.reshape(-1)
    total = pred_flat.shape[0]

    # Pick cols as a multiple of 128 that divides total (free reshape, no
    # copy).  Otherwise fall back to cols=128 on the 128-aligned prefix and
    # fold the <128 leftover elements in plain XLA below.
    cols = 0
    for cand in range(1024, 127, -128):
        if total % cand == 0:
            cols = cand
            break
    if cols == 0:
        cols = 128
    prefix = (total // cols) * cols

    itemsize = max(jnp.dtype(pred.dtype).itemsize, jnp.dtype(depth_gt.dtype).itemsize)
    min_itemsize = min(jnp.dtype(pred.dtype).itemsize, jnp.dtype(depth_gt.dtype).itemsize)
    # Sublane multiple for the narrowest tiled dtype (8 for f32, 16 for bf16, ...).
    mult = max(8, 32 // min_itemsize)

    if prefix > 0:
        rows = prefix // cols
        pred2d = pred_flat[:prefix].reshape(rows, cols)
        gt2d = gt_flat[:prefix].reshape(rows, cols)

        # ~tile_bytes per input per grid step; rows multiple of the sublane pack.
        tile_rows = max(mult, (tile_bytes // (cols * itemsize)) // mult * mult)
        tile_rows = min(tile_rows, _round_up(rows, mult))

        num_blocks = pl.cdiv(rows, tile_rows)
        n_cores = min(n_cores, num_blocks)
        blocks_per_core = pl.cdiv(num_blocks, n_cores)

        def in_map(c, i):
            # Clamp padding blocks to the last real block; they are fully
            # masked in-kernel (blk >= num_blocks -> all rows out of bounds).
            return (jnp.minimum(c * blocks_per_core + i, num_blocks - 1), 0)

        kernel = functools.partial(
            _masked_mse_kernel,
            rows=rows, tile_rows=tile_rows,
            blocks_per_core=blocks_per_core, num_blocks=num_blocks)

        par = getattr(pltpu, "PARALLEL", "parallel")
        arb = getattr(pltpu, "ARBITRARY", "arbitrary")
        core_sem = (getattr(pltpu, "CORE_PARALLEL", par)
                    if (use_core_parallel and n_cores > 1) else par)

        sum_slab, cnt_slab = pl.pallas_call(
            kernel,
            out_shape=(
                jax.ShapeDtypeStruct((n_cores * 8, cols), jnp.float32),
                jax.ShapeDtypeStruct((n_cores * 8, cols), jnp.int32),
            ),
            grid_spec=pltpu.PrefetchScalarGridSpec(
                num_scalar_prefetch=0,
                grid=(n_cores, blocks_per_core),
                in_specs=[
                    pl.BlockSpec((tile_rows, cols), in_map),
                    pl.BlockSpec((tile_rows, cols), in_map),
                ],
                out_specs=[
                    pl.BlockSpec((8, cols), lambda c, i: (c, 0)),
                    pl.BlockSpec((8, cols), lambda c, i: (c, 0)),
                ],
            ),
            compiler_params=pltpu.CompilerParams(
                dimension_semantics=(core_sem, arb),
                vmem_limit_bytes=vmem_limit,
            ),
        )(pred2d, gt2d)

        main_sum = jnp.sum(sum_slab)
        main_cnt = jnp.sum(cnt_slab)
    else:
        main_sum = jnp.zeros((), jnp.float32)
        main_cnt = jnp.zeros((), jnp.int32)

    # Fold the (rare, <128-element) non-128-aligned tail in plain XLA.
    if prefix < total:
        tp = pred_flat[prefix:].astype(jnp.float32)
        tg = gt_flat[prefix:].astype(jnp.float32)
        tmask = jnp.logical_and(tg > 0.0, tg < 95.0)
        main_sum = main_sum + jnp.sum(jnp.where(tmask, (tp - tg) ** 2, 0.0))
        main_cnt = main_cnt + jnp.sum(tmask.astype(jnp.int32))

    # Zero valid elements -> 0/0 = NaN, matching torch MSELoss over an empty
    # selection.  Counts are exact int32; sums in f32.
    return main_sum / main_cnt.astype(jnp.float32)


def _reference(depth_pred, depth_gt):
    pred = jnp.squeeze(depth_pred, axis=1)
    mask = jnp.logical_and(depth_gt > 0.0, depth_gt < 95.0)
    return jnp.sum(jnp.where(mask, (pred - depth_gt) ** 2, 0.0)) / jnp.sum(
        mask.astype(jnp.float32))


if __name__ == "__main__":
    key = jax.random.PRNGKey(0)
    k1, k2, k3, k4 = jax.random.split(key, 4)

    # Main check: small, 128-aligned-total shapes.
    B, H, W = 2, 16, 16
    depth_pred = jax.random.uniform(k1, (B, 1, H, W), jnp.float32) * 100.0
    # gt: mixture of valid depths and invalid values (<=0 or >=95)
    depth_gt = jax.random.uniform(k2, (B, H, W), jnp.float32) * 120.0 - 10.0

    loss = masked_mse_loss(depth_pred, depth_gt)
    loss = jax.block_until_ready(loss)
    ref = _reference(depth_pred, depth_gt)
    assert jnp.allclose(loss, ref, rtol=1e-5, atol=1e-5), (loss, ref)

    # Robustness check: total not a multiple of 128 (prefix kernel + XLA tail).
    B2, H2, W2 = 3, 11, 13
    dp2 = jax.random.uniform(k3, (B2, 1, H2, W2), jnp.float32) * 100.0
    dg2 = jax.random.uniform(k4, (B2, H2, W2), jnp.float32) * 120.0 - 10.0
    loss2 = jax.block_until_ready(masked_mse_loss(dp2, dg2))
    ref2 = _reference(dp2, dg2)
    assert jnp.allclose(loss2, ref2, rtol=1e-5, atol=1e-5), (loss2, ref2)

    print("KERNEL_OK")
</pallas_src>

<mosaic_0001>
module attributes {stable_mosaic.version = 11 : i64} {
  func.func @_masked_mse_kernel(%arg0: i32, %arg1: i32, %arg2: memref<8x512xf32, #tpu.memory_space<vmem>>, %arg3: memref<8x512xf32, #tpu.memory_space<vmem>>, %arg4: memref<8x512xf32, #tpu.memory_space<vmem>>, %arg5: memref<8x512xi32, #tpu.memory_space<vmem>>) attributes {dimension_semantics = [#tpu.dimension_semantics<parallel>, #tpu.dimension_semantics<arbitrary>], iteration_bounds = array<i64: 1, 1>, scalar_prefetch = 0 : i64, scratch_operands = 0 : i64, tpu.core_type = #tpu.core_type<tc>, window_params = [{transform_indices = @transform_0, window_bounds = array<i64: 8, 512>}, {transform_indices = @transform_1, window_bounds = array<i64: 8, 512>}, {transform_indices = @transform_2, window_bounds = array<i64: 8, 512>}, {transform_indices = @transform_3, window_bounds = array<i64: 8, 512>}]} {
    %c0_i32 = arith.constant 0 : i32
    %0 = arith.cmpi eq, %arg1, %c0_i32 : i32
    %1 = arith.extui %0 : i1 to i32
    %c0_i32_0 = arith.constant 0 : i32
    %2 = arith.cmpi ne, %1, %c0_i32_0 : i32
    scf.if %2 {
      %cst_8 = arith.constant 0.000000e+00 : f32
      %19 = vector.broadcast %cst_8 : f32 to vector<8x512xf32>
      %c0_9 = arith.constant 0 : index
      %c0_10 = arith.constant 0 : index
      %20 = vector.load %arg4[%c0_9, %c0_10] : memref<8x512xf32, #tpu.memory_space<vmem>>, vector<8x512xf32>
      tpu.vector_store %arg4[%c0_9, %c0_10], %19 {strides = array<i32>} : memref<8x512xf32, #tpu.memory_space<vmem>>, vector<8x512xf32>,
      %c0_i32_11 = arith.constant 0 : i32
      %21 = vector.broadcast %c0_i32_11 : i32 to vector<8x512xi32>
      %c0_12 = arith.constant 0 : index
      %c0_13 = arith.constant 0 : index
      %22 = vector.load %arg5[%c0_12, %c0_13] : memref<8x512xi32, #tpu.memory_space<vmem>>, vector<8x512xi32>
      tpu.vector_store %arg5[%c0_12, %c0_13], %21 {strides = array<i32>} : memref<8x512xi32, #tpu.memory_space<vmem>>, vector<8x512xi32>,
    } else {
    }
    %c1_i32 = arith.constant 1 : i32
    %3 = arith.muli %arg0, %c1_i32 : i32
    %4 = arith.addi %3, %arg1 : i32
    %c0 = arith.constant 0 : index
    %c0_1 = arith.constant 0 : index
    %5 = vector.load %arg3[%c0, %c0_1] : memref<8x512xf32, #tpu.memory_space<vmem>>, vector<8x512xf32>
    %c0_2 = arith.constant 0 : index
    %c0_3 = arith.constant 0 : index
    %6 = vector.load %arg2[%c0_2, %c0_3] : memref<8x512xf32, #tpu.memory_space<vmem>>, vector<8x512xf32>
    %cst = arith.constant 0.000000e+00 : f32
    %7 = vector.broadcast %cst : f32 to vector<8x512xf32>
    %8 = arith.cmpf ogt, %5, %7 : vector<8x512xf32>
    %cst_4 = arith.constant 9.500000e+01 : f32
    %9 = vector.broadcast %cst_4 : f32 to vector<8x512xf32>
    %10 = arith.cmpf olt, %5, %9 : vector<8x512xf32>
    %11 = arith.andi %8, %10 : vector<8x512xi1>
    %12 = arith.subf %6, %5 : vector<8x512xf32>
    %c0_i32_5 = arith.constant 0 : i32
    %13 = arith.cmpi sge, %4, %c0_i32_5 : i32
    %true = arith.constant true
    %14 = arith.xori %13, %true : i1
    %15 = arith.extui %14 : i1 to i32
    %c0_i32_6 = arith.constant 0 : i32
    %16 = arith.cmpi ne, %15, %c0_i32_6 : i32
    scf.if %16 {
      %19 = arith.mulf %12, %12 : vector<8x512xf32>
      %cst_8 = arith.constant 0.000000e+00 : f32
      %20 = vector.broadcast %cst_8 : f32 to vector<8x512xf32>
      %21 = arith.select %11, %19, %20 : vector<8x512xi1>, vector<8x512xf32>
      %22 = arith.extui %11 : vector<8x512xi1> to vector<8x512xi32>
      %c0_9 = arith.constant 0 : index
      %c0_10 = arith.constant 0 : index
      %23 = vector.load %arg4[%c0_9, %c0_10] : memref<8x512xf32, #tpu.memory_space<vmem>>, vector<8x512xf32>
      %24 = vector.shape_cast %21 : vector<8x512xf32> to vector<1x8x512xf32>
      %cst_11 = arith.constant dense<0.000000e+00> : vector<8x512xf32>
      %25 = vector.multi_reduction <add>, %24, %cst_11 [0] : vector<1x8x512xf32> to vector<8x512xf32>
      %26 = arith.addf %23, %25 : vector<8x512xf32>
      %c0_12 = arith.constant 0 : index
      %c0_13 = arith.constant 0 : index
      %27 = vector.load %arg4[%c0_12, %c0_13] : memref<8x512xf32, #tpu.memory_space<vmem>>, vector<8x512xf32>
      tpu.vector_store %arg4[%c0_12, %c0_13], %26 {strides = array<i32>} : memref<8x512xf32, #tpu.memory_space<vmem>>, vector<8x512xf32>,
      %c0_14 = arith.constant 0 : index
      %c0_15 = arith.constant 0 : index
      %28 = vector.load %arg5[%c0_14, %c0_15] : memref<8x512xi32, #tpu.memory_space<vmem>>, vector<8x512xi32>
      %29 = vector.shape_cast %22 : vector<8x512xi32> to vector<1x8x512xi32>
      %cst_16 = arith.constant dense<0> : vector<8x512xi32>
      %30 = vector.multi_reduction <add>, %29, %cst_16 [0] : vector<1x8x512xi32> to vector<8x512xi32>
      %31 = arith.addi %28, %30 : vector<8x512xi32>
      %c0_17 = arith.constant 0 : index
      %c0_18 = arith.constant 0 : index
      %32 = vector.load %arg5[%c0_17, %c0_18] : memref<8x512xi32, #tpu.memory_space<vmem>>, vector<8x512xi32>
      tpu.vector_store %arg5[%c0_17, %c0_18], %31 {strides = array<i32>} : memref<8x512xi32, #tpu.memory_space<vmem>>, vector<8x512xi32>,
    } else {
    }
    %17 = arith.extui %13 : i1 to i32
    %c0_i32_7 = arith.constant 0 : i32
    %18 = arith.cmpi ne, %17, %c0_i32_7 : i32
    scf.if %18 {
      %19 = tpu.iota {dimensions = array<i32: 0>} : vector<8x512xi32>
      %c8_i32 = arith.constant 8 : i32
      %20 = arith.muli %4, %c8_i32 : i32
      %21 = vector.broadcast %20 : i32 to vector<8x512xi32>
      %22 = arith.addi %19, %21 : vector<8x512xi32>
      %c1_i32_8 = arith.constant 1 : i32
      %23 = vector.broadcast %c1_i32_8 : i32 to vector<8x512xi32>
      %24 = arith.cmpi slt, %22, %23 : vector<8x512xi32>
      %25 = arith.andi %24, %11 : vector<8x512xi1>
      %26 = arith.mulf %12, %12 : vector<8x512xf32>
      %cst_9 = arith.constant 0.000000e+00 : f32
      %27 = vector.broadcast %cst_9 : f32 to vector<8x512xf32>
      %28 = arith.select %25, %26, %27 : vector<8x512xi1>, vector<8x512xf32>
      %29 = arith.extui %25 : vector<8x512xi1> to vector<8x512xi32>
      %c0_10 = arith.constant 0 : index
      %c0_11 = arith.constant 0 : index
      %30 = vector.load %arg4[%c0_10, %c0_11] : memref<8x512xf32, #tpu.memory_space<vmem>>, vector<8x512xf32>
      %31 = vector.shape_cast %28 : vector<8x512xf32> to vector<1x8x512xf32>
      %cst_12 = arith.constant dense<0.000000e+00> : vector<8x512xf32>
      %32 = vector.multi_reduction <add>, %31, %cst_12 [0] : vector<1x8x512xf32> to vector<8x512xf32>
      %33 = arith.addf %30, %32 : vector<8x512xf32>
      %c0_13 = arith.constant 0 : index
      %c0_14 = arith.constant 0 : index
      %34 = vector.load %arg4[%c0_13, %c0_14] : memref<8x512xf32, #tpu.memory_space<vmem>>, vector<8x512xf32>
      tpu.vector_store %arg4[%c0_13, %c0_14], %33 {strides = array<i32>} : memref<8x512xf32, #tpu.memory_space<vmem>>, vector<8x512xf32>,
      %c0_15 = arith.constant 0 : index
      %c0_16 = arith.constant 0 : index
      %35 = vector.load %arg5[%c0_15, %c0_16] : memref<8x512xi32, #tpu.memory_space<vmem>>, vector<8x512xi32>
      %36 = vector.shape_cast %29 : vector<8x512xi32> to vector<1x8x512xi32>
      %cst_17 = arith.constant dense<0> : vector<8x512xi32>
      %37 = vector.multi_reduction <add>, %36, %cst_17 [0] : vector<1x8x512xi32> to vector<8x512xi32>
      %38 = arith.addi %35, %37 : vector<8x512xi32>
      %c0_18 = arith.constant 0 : index
      %c0_19 = arith.constant 0 : index
      %39 = vector.load %arg5[%c0_18, %c0_19] : memref<8x512xi32, #tpu.memory_space<vmem>>, vector<8x512xi32>
      tpu.vector_store %arg5[%c0_18, %c0_19], %38 {strides = array<i32>} : memref<8x512xi32, #tpu.memory_space<vmem>>, vector<8x512xi32>,
    } else {
    }
    return
  }
  func.func @transform_0(%arg0: i32, %arg1: i32) -> (i32, i32) {
    %c1_i32 = arith.constant 1 : i32
    %0 = arith.muli %arg0, %c1_i32 : i32
    %1 = arith.addi %0, %arg1 : i32
    %c0_i32 = arith.constant 0 : i32
    %2 = arith.minsi %1, %c0_i32 : i32
    %c0_i32_0 = arith.constant 0 : i32
    %c0_i32_1 = arith.constant 0 : i32
    return %2, %c0_i32_0 : i32, i32
  }
  func.func @transform_1(%arg0: i32, %arg1: i32) -> (i32, i32) {
    %c1_i32 = arith.constant 1 : i32
    %0 = arith.muli %arg0, %c1_i32 : i32
    %1 = arith.addi %0, %arg1 : i32
    %c0_i32 = arith.constant 0 : i32
    %2 = arith.minsi %1, %c0_i32 : i32
    %c0_i32_0 = arith.constant 0 : i32
    %c0_i32_1 = arith.constant 0 : i32
    return %2, %c0_i32_0 : i32, i32
  }
  func.func @transform_2(%arg0: i32, %arg1: i32) -> (i32, i32) {
    %c0_i32 = arith.constant 0 : i32
    %c0_i32_0 = arith.constant 0 : i32
    return %arg0, %c0_i32 : i32, i32
  }
  func.func @transform_3(%arg0: i32, %arg1: i32) -> (i32, i32) {
    %c0_i32 = arith.constant 0 : i32
    %c0_i32_0 = arith.constant 0 : i32
    return %arg0, %c0_i32 : i32, i32
  }
}

</mosaic_0001>

<bundles_post_ra>
// kernel: tpu_custom_call.1
= control target key start
LH: loop header
LB: loop body
LE: loop exit
PB: predicated region body
PF: predicated region fallthrough
CT: control target
= control target key end

     0   :  { %9 = vsyncpa [#allocation3], 0  ;;  %s838_s0 = inlined_call_operand.hbm [shape: f32[1,512], index: 0, kind: input, shape index: {}]   ;;  %s839_s1 = inlined_call_operand.hbm [shape: f32[1,512], index: 1, kind: input, shape index: {}]   ;;  %s840_s2 = inlined_call_operand.hbm [shape: f32[8,512], index: 2, kind: output, shape index: {0}]   ;;  %s841_s3 = inlined_call_operand.hbm [shape: s32[8,512], index: 3, kind: output, shape index: {1}]  }
   0x1   :  { %10 = vsyncpa [#allocation6], 0 }
   0x2   :  { %11 = vsyncpa [#allocation4], 0 }
   0x3   :  { %12 = vsyncpa [#allocation9], 0 }
   0x4   :  { %24 = vsyncadd [#allocation3], 448  ;;  %s707_s12 = smov [#allocation2]   ;;  %s611_s16 = scalar_lea.hbm %s838_s0, 64 }
   0x5   :  { %s30_s13 = sshll.u32 %s707_s12, 4  ;;  %p612_p0 = scmp.ne.s32.totalorder %s838_s0, %s611_s16  ;;  %s31_s13 = int_to_ptr.vmem [resolvable:$true] %s30_s13 }
   0x6   :  { %p615_p1 = scmp.lt.u32.totalorder %s611_s16, %s838_s0 }
   0x8   :  { %p617_p2 = pnand %p615_p1, %p612_p0 }
   0xa   :  { %620 = shalt.err (!%p617_p2)
}
   0xb   :  { %s621_s21 = scalar_lea.vmem %s31_s13, 64  ;;  %s625_s22 = scalar_lea.vmem %s31_s13, 512 }
   0xc   :  { %p622_p3 = scmp.ne.s32.totalorder %s31_s13, %s621_s21  ;;  %p626_p4 = scmp.lt.s32.totalorder %s31_s13, %s31_s13 }
   0xd   :  { %p627_p5 = scmp.lt.s32.totalorder %s625_s22, %s621_s21 }
   0xf   :  { %p628_p6 = por %p627_p5, %p626_p4 }
  0x11   :  { %p629_p7 = pnand %p628_p6, %p622_p3 }
  0x13   :  { %632 = shalt.err (!%p629_p7)
}
  0x14   :  { %s708_s23 = smov 64   ;;  %s709_s24 = smov 4  }
  0x15   :  { %36 = dma.hbm_to_vmem [thread:$0]  %s838_s0, 64, %s31_s13, [#allocation3], %s708_s23, %s708_s23, %s709_s24  }
  0x16   :  { %48 = vsyncadd [#allocation6], 448  ;;  %s710_s27 = smov [#allocation5]   ;;  %s633_s4 = scalar_lea.hbm %s839_s1, 64 }
  0x17   :  { %s54_s28 = sshll.u32 %s710_s27, 4  ;;  %p634_p8 = scmp.ne.s32.totalorder %s839_s1, %s633_s4  ;;  %s55_s28 = int_to_ptr.vmem [resolvable:$true] %s54_s28 }
  0x18   :  { %p637_p9 = scmp.lt.u32.totalorder %s633_s4, %s839_s1 }
  0x1a   :  { %p639_p10 = pnand %p637_p9, %p634_p8 }
  0x1c   :  { %642 = shalt.err (!%p639_p10)
}
  0x1d   :  { %s643_s9 = scalar_lea.vmem %s55_s28, 64  ;;  %s647_s0 = scalar_lea.vmem %s55_s28, 512 }
  0x1e   :  { %p644_p11 = scmp.ne.s32.totalorder %s55_s28, %s643_s9  ;;  %p648_p12 = scmp.lt.s32.totalorder %s55_s28, %s55_s28 }
  0x1f   :  { %p649_p13 = scmp.lt.s32.totalorder %s647_s0, %s643_s9 }
  0x21   :  { %p650_p0 = por %p649_p13, %p648_p12 }
  0x23   :  { %p651_p1 = pnand %p650_p0, %p644_p11 }
  0x25   :  { %654 = shalt.err (!%p651_p1)
}
  0x26   :  { %60 = dma.hbm_to_vmem [thread:$0]  %s839_s1, 64, %s55_s28, [#allocation6], %s708_s23, %s708_s23, %s709_s24  }
  0x27   :  { %699 = dma.done.wait [#allocation3], 512  }
  0x28   :  { %700 = vsyncadd [#allocation3], 4294966784 }
  0x29   :  { %701 = dma.done.wait [#allocation6], 512  }
  0x2a   :  { %702 = vsyncadd [#allocation6], 4294966784  ;;  %v354_v0 = vlaneseq  ;;  %v711_v1 = vmov 1966171168   ;;  %v94_v5 = vld [vmem:[#allocation5] sm:$0xf] }
  0x2b   :  { %v373_v2 = vunpack.c.l.s4 %v711_v1  ;;  %v95_v6 = vld [vmem:[#allocation5 + $0x4] sm:$0xf]  ;;  %v96_v7 = vld [vmem:[#allocation5 + $0x8] sm:$0xf]  ;;  %v97_v8 = vld [vmem:[#allocation5 + $0xc] sm:$0xf] }
  0x2c   :  { %v759_v3 = vshrl.u32 %v354_v0, 7  ;;  %v98_v9 = vld [vmem:[#allocation5 + $0x10] sm:$0xf]  ;;  %v99_v10 = vld [vmem:[#allocation5 + $0x14] sm:$0xf]  ;;  %vm110_vm0 = vcmp.gt.f32.partialorder %v94_v5, 0.0 }
  0x2d   :  { %v374_v4 = vunpack.c.0.s8 %v373_v2  ;;  %v100_v11 = vld [vmem:[#allocation5 + $0x18] sm:$0xf]  ;;  %v101_v12 = vld [vmem:[#allocation5 + $0x1c] sm:$0xf]  ;;  %v102_v13 = vld [vmem:[#allocation2] sm:$0xf] }
  0x2e   :  { %v103_v14 = vld [vmem:[#allocation2 + $0x4] sm:$0xf]  ;;  %v104_v15 = vld [vmem:[#allocation2 + $0x8] sm:$0xf]  ;;  %v105_v16 = vld [vmem:[#allocation2 + $0xc] sm:$0xf]  ;;  %v134_v20 = vsub.f32 %v102_v13, %v94_v5 }
  0x2f   :  { %v762_v17 = vsub.s32 %v374_v4, %v759_v3  ;;  %v106_v18 = vld [vmem:[#allocation2 + $0x10] sm:$0xf]  ;;  %v107_v19 = vld [vmem:[#allocation2 + $0x14] sm:$0xf]  ;;  %v135_v21 = vsub.f32 %v103_v14, %v95_v6  ;;  %v136_v22 = vsub.f32 %v104_v15, %v96_v7  ;;  %v137_v23 = vsub.f32 %v105_v16, %v97_v8  ;;  %v108_v24 = vld [vmem:[#allocation2 + $0x18] sm:$0xf] }
  0x30   :  { %v109_v25 = vld [vmem:[#allocation2 + $0x1c] sm:$0xf]  ;;  %vm116_vm6 = vcmp.gt.f32.partialorder %v100_v11, 0.0  ;;  %vm118_vm8 = vcmp.lt.f32.partialorder %v94_v5, 95.0  ;;  %vm119_vm9 = vcmp.lt.f32.partialorder %v95_v6, 95.0  ;;  %vm120_vm10 = vcmp.lt.f32.partialorder %v96_v7, 95.0 }
  0x31   :  { %vm121_vm11 = vcmp.lt.f32.partialorder %v97_v8, 95.0  ;;  %vm122_vm12 = vcmp.lt.f32.partialorder %v98_v9, 95.0  ;;  %vm123_vm13 = vcmp.lt.f32.partialorder %v99_v10, 95.0  ;;  %vm124_vm14 = vcmp.lt.f32.partialorder %v100_v11, 95.0  ;;  %vm126_vm1 = vmand %vm110_vm0, %vm118_vm8  ;;  %s713_s1 = smov [#allocation7]   ;;  %s714_s13 = smov [#allocation8]  }
  0x32   :  { %vm842_vm2 = vcmp.gt.f32.partialorder %v95_v6, 0.0  ;;  %v138_v26 = vsub.f32 %v106_v18, %v98_v9  ;;  %v139_v27 = vsub.f32 %v107_v19, %v99_v10  ;;  %v140_v28 = vsub.f32 %v108_v24, %v100_v11  ;;  %s574_s12 = sshll.u32 %s713_s1, 4  ;;  %s584_s14 = sshll.u32 %s714_s13, 4  ;;  %s575_s12 = int_to_ptr.vmem [resolvable:$true] %s574_s12  ;;  %s585_s14 = int_to_ptr.vmem [resolvable:$true] %s584_s14 }
  0x33   :  { %vm127_vm3 = vmand %vm842_vm2, %vm119_vm9  ;;  %v141_v29 = vsub.f32 %v109_v25, %v101_v12  ;;  %vm843_vm4 = vcmp.gt.f32.partialorder %v96_v7, 0.0  ;;  %v712_v30 = vmov 0   ;;  %v444_v33 = vmul.f32 %v134_v20, %v134_v20  ;;  %s655_s15 = scalar_lea.vmem %s575_s12, 512  ;;  %p660_p3 = scmp.lt.s32.totalorder %s575_s12, %s575_s12 }
  0x34   :  { %vm128_vm5 = vmand %vm843_vm4, %vm120_vm10  ;;  %v360_v31 = vsel %vm126_vm1, 1, %v712_v30  ;;  %v361_v32 = vsel %vm127_vm3, 1, %v712_v30  ;;  %v445_v34 = vmul.f32 %v135_v21, %v135_v21  ;;  %vm844_vm7 = vcmp.gt.f32.partialorder %v97_v8, 0.0  ;;  %p656_p2 = scmp.ne.s32.totalorder %s575_s12, %s655_s15  ;;  %p661_p4 = scmp.lt.s32.totalorder %s655_s15, %s655_s15 }
  0x35   :  { %vm129_vm15 = vmand %vm844_vm7, %vm121_vm11  ;;  %v362_v35 = vsel %vm128_vm5, 1, %v712_v30  ;;  %v368_v36 = vcombine.low %v360_v31, %v361_v32  ;;  %v446_v37 = vmul.f32 %v136_v22, %v136_v22  ;;  %v447_v38 = vmul.f32 %v137_v23, %v137_v23 }
  0x36   :  { %vm845_vm0 = vcmp.gt.f32.partialorder %v98_v9, 0.0  ;;  %v363_v39 = vsel %vm129_vm15, 1, %v712_v30  ;;  %v448_v40 = vmul.f32 %v138_v26, %v138_v26  ;;  %v449_v41 = vmul.f32 %v139_v27, %v139_v27  ;;  %vm132_vm4 = vmand %vm116_vm6, %vm124_vm14  ;;  %p662_p5 = por %p661_p4, %p660_p3 }
  0x37   :  { %vm130_vm2 = vmand %vm845_vm0, %vm122_vm12  ;;  %v450_v42 = vmul.f32 %v140_v28, %v140_v28  ;;  %vm846_vm1 = vcmp.gt.f32.partialorder %v99_v10, 0.0  ;;  %v369_v44 = vcombine.low %v362_v35, %v363_v39  ;;  %v378_v45 = vrot.slane %v368_v36, %v762_v17 }
  0x38   :  { %vm131_vm3 = vmand %vm846_vm1, %vm123_vm13  ;;  %v364_v43 = vsel %vm130_vm2, 1, %v712_v30  ;;  %v451_v46 = vmul.f32 %v141_v29, %v141_v29  ;;  %v460_v48 = vcombine.low %v444_v33, %v445_v34  ;;  %v461_v49 = vcombine.low %v446_v37, %v447_v38  ;;  %p663_p6 = pnand %p662_p5, %p656_p2 }
  0x39   :  { %v365_v47 = vsel %vm131_vm3, 1, %v712_v30  ;;  %v462_v50 = vcombine.low %v448_v40, %v449_v41  ;;  %vm847_vm5 = vcmp.lt.f32.partialorder %v101_v12, 95.0  ;;  %vm848_vm7 = vcmp.gt.f32.partialorder %v101_v12, 0.0 }
  0x3a   :  { %vm133_vm8 = vmand %vm848_vm7, %vm847_vm5  ;;  %v366_v51 = vsel %vm132_vm4, 1, %v712_v30  ;;  %v370_v52 = vcombine.low %v364_v43, %v365_v47  ;;  %v385_v53 = vrot.slane %v369_v44, %v762_v17  ;;  %v463_v54 = vcombine.low %v450_v42, %v451_v46 }
  0x3b   :  { %v367_v55 = vsel %vm133_vm8, 1, %v712_v30  ;;  %v470_v56 = vrot.slane %v460_v48, %v762_v17  ;;  %v477_v57 = vrot.slane %v461_v49, %v762_v17  ;;  %v484_v58 = vrot.slane %v462_v50, %v762_v17 }
  0x3c   :  { %v371_v59 = vcombine.low %v366_v51, %v367_v55  ;;  %v392_v60 = vrot.slane %v370_v52, %v762_v17  ;;  %v400_v61 = vcombine.low %v378_v45, %v385_v53  ;;  %v491_v62 = vrot.slane %v463_v54, %v762_v17 }
  0x3d   :  { %v492_v63 = vcombine.low %v470_v56, %v477_v57  ;;  %v401_v0 = vcombine.high %v378_v45, %v385_v53  ;;  %v493_v1 = vcombine.high %v470_v56, %v477_v57  ;;  %vm359_vm6 = vcmp.lt.s32.totalorder %v759_v3, 1 }
  0x3e   :  { %v399_v2 = vrot.slane %v371_v59, %v762_v17  ;;  %v494_v4 = vcombine.low %v484_v58, %v491_v62  ;;  %v495_v5 = vcombine.high %v484_v58, %v491_v62  ;;  %v410_v6 = vrot.slane %v400_v61, %v762_v17 }
  0x3f   :  { %v502_v7 = vrot.slane %v492_v63, %v762_v17  ;;  %v417_v11 = vrot.slane %v401_v0, %v762_v17  ;;  %v509_v12 = vrot.slane %v493_v1, %v762_v17 }
  0x40   :  { %v402_v8 = vcombine.low %v392_v60, %v399_v2  ;;  %v516_v9 = vrot.slane %v494_v4, %v762_v17  ;;  %v403_v10 = vcombine.high %v392_v60, %v399_v2  ;;  %v523_v13 = vrot.slane %v495_v5, %v762_v17 }
  0x42   :  { %v424_v14 = vrot.slane %v402_v8, %v762_v17  ;;  %v431_v15 = vrot.slane %v403_v10, %v762_v17  ;;  %v524_v16 = vcombine.low %v502_v7, %v516_v9  ;;  %v526_v22 = vcombine.low %v509_v12, %v523_v13 }
  0x43   :  { %v525_v23 = vcombine.high %v502_v7, %v516_v9  ;;  %v527_v24 = vcombine.high %v509_v12, %v523_v13 }
  0x44   :  { %v432_v18 = vcombine.low %v410_v6, %v424_v14  ;;  %v434_v19 = vcombine.low %v417_v11, %v431_v15  ;;  %v433_v20 = vcombine.high %v410_v6, %v424_v14  ;;  %v435_v21 = vcombine.high %v417_v11, %v431_v15 }
  0x46   :  { %vm436_vm9 = vcmp.ne.s32.totalorder %v432_v18, 0  ;;  %vm437_vm10 = vcmp.ne.s32.totalorder %v434_v19, 0  ;;  %vm438_vm11 = vcmp.ne.s32.totalorder %v433_v20, 0  ;;  %vm439_vm13 = vcmp.ne.s32.totalorder %v435_v21, 0 }
  0x47   :  { %vm440_vm12 = vmand %vm359_vm6, %vm436_vm9 }
  0x48   :  { %v532_v25 = vsel %vm440_vm12, %v524_v16, 0.0  ;;  %vm441_vm14 = vmand %vm359_vm6, %vm437_vm10  ;;  %v536_v17 = vsel %vm440_vm12, 1, %v712_v30 }
  0x49   :  { %v533_v26 = vsel %vm441_vm14, %v526_v22, 0.0  ;;  %vm442_vm15 = vmand %vm359_vm6, %vm438_vm11  ;;  %v537_v27 = vsel %vm441_vm14, 1, %v712_v30  ;;  %552 = vst [vmem:[#allocation7] sm:$0xff] %v532_v25 }
  0x4a   :  { %v534_v28 = vsel %vm442_vm15, %v525_v23, 0.0  ;;  %vm443_vm0 = vmand %vm359_vm6, %vm439_vm13  ;;  %v538_v29 = vsel %vm442_vm15, 1, %v712_v30  ;;  %564 = vst [vmem:[#allocation8] sm:$0xff] %v536_v17 }
  0x4b   :  { %v535_v31 = vsel %vm443_vm0, %v527_v24, 0.0  ;;  %v539_v32 = vsel %vm443_vm0, 1, %v712_v30  ;;  %553 = vst [vmem:[#allocation7 + $0x8] sm:$0xff] %v533_v26  ;;  %565 = vst [vmem:[#allocation8 + $0x8] sm:$0xff] %v537_v27 }
  0x4c   :  { %554 = vst [vmem:[#allocation7 + $0x10] sm:$0xff] %v534_v28  ;;  %566 = vst [vmem:[#allocation8 + $0x10] sm:$0xff] %v538_v29 }
  0x4d   :  { %555 = vst [vmem:[#allocation7 + $0x18] sm:$0xff] %v535_v31  ;;  %567 = vst [vmem:[#allocation8 + $0x18] sm:$0xff] %v539_v32 }
  0x4e   :  { %666 = shalt.err (!%p663_p6)
}
  0x4f   :  { %s667_s18 = scalar_lea.hbm %s840_s2, 512 }
  0x50   :  { %p668_p7 = scmp.ne.s32.totalorder %s840_s2, %s667_s18  ;;  %p671_p8 = scmp.lt.u32.totalorder %s667_s18, %s840_s2 }
  0x52   :  { %p673_p9 = pnand %p671_p8, %p668_p7 }
  0x54   :  { %676 = shalt.err (!%p673_p9)
}
  0x55   :  { %577 = dma.vmem_to_hbm [thread:$0]  %s575_s12, 512, %s840_s2, [#allocation4]  }
  0x56   :  { %s677_s25 = scalar_lea.vmem %s585_s14, 512  ;;  %p682_p11 = scmp.lt.s32.totalorder %s585_s14, %s585_s14 }
  0x57   :  { %p678_p10 = scmp.ne.s32.totalorder %s585_s14, %s677_s25  ;;  %p683_p12 = scmp.lt.s32.totalorder %s677_s25, %s677_s25 }
  0x59   :  { %p684_p13 = por %p683_p12, %p682_p11 }
  0x5b   :  { %p685_p0 = pnand %p684_p13, %p678_p10 }
  0x5d   :  { %688 = shalt.err (!%p685_p0)
}
  0x5e   :  { %s689_s28 = scalar_lea.hbm %s841_s3, 512 }
  0x5f   :  { %p690_p1 = scmp.ne.s32.totalorder %s841_s3, %s689_s28  ;;  %p693_p2 = scmp.lt.u32.totalorder %s689_s28, %s841_s3 }
  0x61   :  { %p695_p3 = pnand %p693_p2, %p690_p1 }
  0x63   :  { %698 = shalt.err (!%p695_p3)
}
  0x64   :  { %587 = dma.vmem_to_hbm [thread:$0]  %s585_s14, 512, %s841_s3, [#allocation9]  }
  0x65   :  { %703 = dma.done.wait [#allocation4], 512  }
  0x66   :  { %704 = vsyncadd [#allocation4], 4294966784 }
  0x67   :  { %705 = dma.done.wait [#allocation9], 512  }
  0x68   :  { %706 = vsyncadd [#allocation9], 4294966784 }
  0x69   :  { %594 = vsyncpa [#allocation3], 1 }
  0x6a   :  { %595 = vsyncpa [#allocation6], 1 }
  0x6b   :  { %596 = vsyncpa [#allocation4], 1 }
  0x6c   :  { %597 = vsyncpa [#allocation9], 1 }

</bundles_post_ra>
